<compile_context>
chip_gen: v6e
topology: v6e:2x2x1
jax: 0.10.0
libtpu: 0.0.40
codegen_flags: <defaults>
</compile_context>

<pallas_src>
import functools
import math

import jax
import jax.numpy as jnp
from jax.experimental import pallas as pl
from jax.experimental.pallas import tpu as pltpu


def _alpha_relu_kernel(x_ref, o_ref, *, alpha):
    x = x_ref[...]
    y = alpha * x  # weak-typed scalar: keeps float dtype, promotes ints (torch semantics)
    o_ref[...] = jnp.where(x > 0, y, jnp.zeros_like(y)).astype(o_ref.dtype)


# Candidate lane widths (multiples of 128). Pick the largest that divides the
# total element count so the flattening reshape is free (no extra HBM pass).
_LANE_WIDTHS = (8192, 4096, 2048, 1024, 512, 256, 128)

# Per-buffer tile target. BlockSpec double-buffers the input and the output, so
# pipeline footprint ~= 4x this. 4 MiB/tile => ~16 MiB of pipeline buffers:
# fits v7x's 64 MiB VMEM (32 MiB scoped default) with megacore headroom, and
# gives ~1.3-5 us of DMA per step on v7x/v6e/v5e — comfortably amortizing the
# ~0.35 us fixed per-grid-step overhead (>=85% of HBM roofline).
_TILE_BYTES_TARGET = 4 * 1024 * 1024
_VMEM_LIMIT_BYTES = 32 * 1024 * 1024


def _round_down8(v):
    return max(8, (v // 8) * 8)


def alpha_relu(x, alpha=1.0):
    """Elementwise AlphaReLU (torch.where(x > 0, alpha * x, 0)) over any-rank arrays."""
    orig_shape = x.shape
    total = math.prod(orig_shape) if orig_shape else 1

    # torch promotion: python-float alpha * integer tensor -> float tensor.
    if isinstance(alpha, float) and not jnp.issubdtype(x.dtype, jnp.floating):
        out_dtype = jnp.float32
    else:
        out_dtype = x.dtype

    if total == 0:
        return jnp.zeros(orig_shape, out_dtype)

    # --- Flatten to a lane-dense (M, W) slab --------------------------------
    flat = x.reshape(-1)
    width = next((w for w in _LANE_WIDTHS if total % w == 0), None)
    padded_total = total
    if width is None:
        # Awkward total: pad the flat vector to a 128 multiple (one extra copy,
        # only for non-lane-aligned sizes); padding zeros map to zeros.
        width = 128
        padded_total = ((total + width - 1) // width) * width
        flat = jnp.pad(flat, (0, padded_total - total))
    x2 = flat.reshape(padded_total // width, width)
    M, W = x2.shape

    # --- Row tile from the VMEM budget ---------------------------------------
    in_item = jnp.dtype(x2.dtype).itemsize
    out_item = jnp.dtype(out_dtype).itemsize
    row_bytes = W * max(in_item, out_item)
    tb = _round_down8(_TILE_BYTES_TARGET // row_bytes)
    if M <= 8:
        tb = M  # single block; "equal to full dim" satisfies the (8,128) rule
    else:
        # Keep >= 2 grid steps so both v7x TensorCores get work (grid axis is
        # marked "parallel"); no effect on single-TC v5e/v6e.
        tb = min(tb, _round_down8((M + 1) // 2))
    grid = (pl.cdiv(M, tb),)
    # NOTE: if M % tb != 0 the final block is partial (masked stores); we accept
    # that rather than paying an extra HBM pass to pad M up to a tb multiple.

    out2 = pl.pallas_call(
        functools.partial(_alpha_relu_kernel, alpha=alpha),
        out_shape=jax.ShapeDtypeStruct((M, W), out_dtype),
        grid_spec=pltpu.PrefetchScalarGridSpec(
            num_scalar_prefetch=0,
            grid=grid,
            in_specs=[pl.BlockSpec((tb, W), lambda i: (i, 0))],
            out_specs=pl.BlockSpec((tb, W), lambda i: (i, 0)),
        ),
        compiler_params=pltpu.CompilerParams(
            dimension_semantics=("parallel",),
            vmem_limit_bytes=_VMEM_LIMIT_BYTES,
        ),
        cost_estimate=pl.CostEstimate(
            flops=2 * M * W,                       # compare + scale per element
            transcendentals=0,
            bytes_accessed=M * W * (in_item + out_item),
        ),
    )(x2)

    out_flat = out2.reshape(-1)
    if padded_total != total:
        out_flat = out_flat[:total]
    return out_flat.reshape(orig_shape)


if __name__ == "__main__":
    key = jax.random.PRNGKey(0)
    alpha = 1.5

    # Small example consistent with the module's MLP usage: batch=16, hidden=256.
    x = jax.random.normal(key, (16, 256), dtype=jnp.float32)
    out = alpha_relu(x, alpha=alpha)
    jax.block_until_ready(out)
    ref = jnp.where(x > 0, alpha * x, jnp.zeros_like(x))
    assert out.shape == x.shape and out.dtype == x.dtype
    assert jnp.allclose(out, ref, atol=0.0, rtol=0.0)

    # 1-D, non-lane-aligned size: exercises the flat pad/slice path.
    x1 = jax.random.normal(jax.random.PRNGKey(1), (1000,), dtype=jnp.float32)
    out1 = alpha_relu(x1, alpha=alpha)
    jax.block_until_ready(out1)
    ref1 = jnp.where(x1 > 0, alpha * x1, jnp.zeros_like(x1))
    assert out1.shape == x1.shape
    assert jnp.allclose(out1, ref1, atol=0.0, rtol=0.0)

    # 3-D bf16 input: exercises sub-32-bit dtype and the free (M, W) reshape.
    x3 = jax.random.normal(jax.random.PRNGKey(2), (2, 4, 96), dtype=jnp.bfloat16)
    out3 = alpha_relu(x3, alpha=alpha)
    jax.block_until_ready(out3)
    ref3 = jnp.where(x3 > 0, jnp.bfloat16(alpha) * x3, jnp.zeros_like(x3))
    assert out3.shape == x3.shape and out3.dtype == x3.dtype
    assert jnp.allclose(out3.astype(jnp.float32), ref3.astype(jnp.float32),
                        atol=1e-2, rtol=1e-2)

    print("KERNEL_OK")
</pallas_src>

<mosaic_0001>
module attributes {stable_mosaic.version = 11 : i64} {
  func.func @_alpha_relu_kernel(%arg0: i32, %arg1: memref<1x4096xf32, #tpu.memory_space<vmem>>, %arg2: memref<1x4096xf32, #tpu.memory_space<vmem>>) attributes {dimension_semantics = [#tpu.dimension_semantics<parallel>], iteration_bounds = array<i64: 1>, scalar_prefetch = 0 : i64, scratch_operands = 0 : i64, tpu.core_type = #tpu.core_type<tc>, window_params = [{transform_indices = @transform_0, window_bounds = array<i64: 1, 4096>}, {transform_indices = @transform_1, window_bounds = array<i64: 1, 4096>}]} {
    %c0 = arith.constant 0 : index
    %c0_0 = arith.constant 0 : index
    %0 = vector.load %arg1[%c0, %c0_0] : memref<1x4096xf32, #tpu.memory_space<vmem>>, vector<1x4096xf32>
    %cst = arith.constant 1.500000e+00 : f32
    %1 = vector.broadcast %cst : f32 to vector<1x4096xf32>
    %2 = arith.mulf %1, %0 : vector<1x4096xf32>
    %cst_1 = arith.constant 0.000000e+00 : f32
    %3 = vector.broadcast %cst_1 : f32 to vector<1x4096xf32>
    %4 = arith.cmpf ogt, %0, %3 : vector<1x4096xf32>
    %cst_2 = arith.constant 0.000000e+00 : f32
    %5 = vector.broadcast %cst_2 : f32 to vector<1x4096xf32>
    %6 = arith.select %4, %2, %5 : vector<1x4096xi1>, vector<1x4096xf32>
    %c0_3 = arith.constant 0 : index
    %c0_4 = arith.constant 0 : index
    %7 = vector.load %arg2[%c0_3, %c0_4] : memref<1x4096xf32, #tpu.memory_space<vmem>>, vector<1x4096xf32>
    tpu.vector_store %arg2[%c0_3, %c0_4], %6 {strides = array<i32>} : memref<1x4096xf32, #tpu.memory_space<vmem>>, vector<1x4096xf32>,
    return
  }
  func.func @transform_0(%arg0: i32) -> (i32, i32) {
    %c0_i32 = arith.constant 0 : i32
    %c0_i32_0 = arith.constant 0 : i32
    return %arg0, %c0_i32 : i32, i32
  }
  func.func @transform_1(%arg0: i32) -> (i32, i32) {
    %c0_i32 = arith.constant 0 : i32
    %c0_i32_0 = arith.constant 0 : i32
    return %arg0, %c0_i32 : i32, i32
  }
}

</mosaic_0001>

<bundles_post_ra>
// kernel: tpu_custom_call.1
= control target key start
LH: loop header
LB: loop body
LE: loop exit
PB: predicated region body
PF: predicated region fallthrough
CT: control target
= control target key end

     0   :  { %6 = vsyncpa [#allocation3], 0  ;;  %s120_s0 = inlined_call_operand.hbm [shape: f32[1,4096], index: 0, kind: input, shape index: {}]   ;;  %s121_s1 = inlined_call_operand.hbm [shape: f32[1,4096], index: 1, kind: output, shape index: {}]  }
   0x1   :  { %7 = vsyncpa [#allocation4], 0  ;;  %s102_s6 = smov [#allocation2]  }
   0x2   :  { %s14_s7 = sshll.u32 %s102_s6, 4  ;;  %s15_s7 = int_to_ptr.vmem [resolvable:$true] %s14_s7 }
   0x3   :  { %s66_s8 = scalar_lea.vmem %s15_s7, 512  ;;  %p71_p1 = scmp.lt.s32.totalorder %s15_s7, %s15_s7 }
   0x4   :  { %p67_p0 = scmp.ne.s32.totalorder %s15_s7, %s66_s8  ;;  %p72_p2 = scmp.lt.s32.totalorder %s66_s8, %s66_s8 }
   0x6   :  { %p73_p3 = por %p72_p2, %p71_p1 }
   0x8   :  { %p74_p4 = pnand %p73_p3, %p67_p0 }
   0xa   :  { %77 = shalt.err (!%p74_p4)
}
   0xb   :  { %17 = dma.hbm_to_vmem [thread:$0]  %s120_s0, 512, %s15_s7, [#allocation3]  }
   0xc   :  { %98 = dma.done.wait [#allocation3], 512  }
   0xd   :  { %99 = vsyncadd [#allocation3], 4294966784  ;;  %v21_v0 = vld [vmem:[#allocation2] sm:$0xff]  ;;  %v22_v1 = vld [vmem:[#allocation2 + $0x8] sm:$0xff]  ;;  %s103_s11 = smov [#allocation5]  }
   0xe   :  { %v23_v2 = vld [vmem:[#allocation2 + $0x10] sm:$0xff]  ;;  %s47_s12 = sshll.u32 %s103_s11, 4  ;;  %v25_v3 = vmul.f32 1.5, %v21_v0  ;;  %vm29_vm0 = vcmp.gt.f32.partialorder %v21_v0, 0.0  ;;  %v26_v4 = vmul.f32 1.5, %v22_v1  ;;  %vm30_vm1 = vcmp.gt.f32.partialorder %v22_v1, 0.0  ;;  %s48_s12 = int_to_ptr.vmem [resolvable:$true] %s47_s12 }
   0xf   :  { %v24_v5 = vld [vmem:[#allocation2 + $0x18] sm:$0xff]  ;;  %v27_v6 = vmul.f32 1.5, %v23_v2  ;;  %vm31_vm2 = vcmp.gt.f32.partialorder %v23_v2, 0.0  ;;  %s78_s0 = scalar_lea.vmem %s48_s12, 512  ;;  %p83_p6 = scmp.lt.s32.totalorder %s48_s12, %s48_s12 }
  0x10   :  { %v28_v7 = vmul.f32 1.5, %v24_v5  ;;  %vm32_vm3 = vcmp.gt.f32.partialorder %v24_v5, 0.0  ;;  %v33_v8 = vsel %vm29_vm0, %v25_v3, 0.0  ;;  %v34_v9 = vsel %vm30_vm1, %v26_v4, 0.0  ;;  %p79_p5 = scmp.ne.s32.totalorder %s48_s12, %s78_s0  ;;  %p84_p7 = scmp.lt.s32.totalorder %s78_s0, %s78_s0 }
  0x11   :  { %37 = vst [vmem:[#allocation5] sm:$0xff] %v33_v8  ;;  %38 = vst [vmem:[#allocation5 + $0x8] sm:$0xff] %v34_v9  ;;  %v35_v10 = vsel %vm31_vm2, %v27_v6, 0.0 }
  0x12   :  { %v36_v11 = vsel %vm32_vm3, %v28_v7, 0.0  ;;  %39 = vst [vmem:[#allocation5 + $0x10] sm:$0xff] %v35_v10  ;;  %p85_p8 = por %p84_p7, %p83_p6 }
  0x13   :  { %40 = vst [vmem:[#allocation5 + $0x18] sm:$0xff] %v36_v11 }
  0x14   :  { %p86_p9 = pnand %p85_p8, %p79_p5 }
  0x16   :  { %89 = shalt.err (!%p86_p9)
}
  0x17   :  { %50 = dma.vmem_to_hbm [thread:$0]  %s48_s12, 512, %s121_s1, [#allocation4]  }
  0x18   :  { %100 = dma.done.wait [#allocation4], 512  }
  0x19   :  { %101 = vsyncadd [#allocation4], 4294966784 }
  0x1a   :  { %54 = vsyncpa [#allocation3], 1 }
  0x1b   :  { %55 = vsyncpa [#allocation4], 1 }

</bundles_post_ra>
